<compile_context>
chip_gen: v7x
topology: tpu7x:2x2x1
jax: 0.10.0
libtpu: 0.0.40
codegen_flags: <defaults>
</compile_context>

<pallas_src>
import functools

import jax
import jax.numpy as jnp
from jax import lax
from jax.experimental import pallas as pl
from jax.experimental.pallas import tpu as pltpu


_POOL = 16                            # concurrent row DMAs / semaphore slots
_TARGET_TILE_BYTES = 512 * 1024       # aim to move >=512 KiB per grid step
_MAX_TILE_BYTES = 8 * 1024 * 1024     # <=8 MiB tile -> <=16 MiB double-buffered (v7x-safe)
_MAX_IDS_PER_CALL = 32768             # cap the scalar-prefetched id table (SMEM is tiny)


def _gather_kernel(ids_ref, w_hbm, out_ref, sem):
    """One grid step gathers `tile_n` embedding rows from HBM into the output block.

    ids_ref : SMEM (chunk_n,) int32   -- scalar-prefetched flattened token ids
    w_hbm   : HBM  (ntoken, emb_dim)  -- full table, never copied wholesale
    out_ref : VMEM (tile_n, emb_dim)  -- output tile; DMAs land here directly
    sem     : DMA semaphores (_POOL,) -- round-robin pool, <=_POOL rows in flight
    """
    tile_n = out_ref.shape[0]
    base = pl.program_id(0) * tile_n

    def row_copy(t, slot):
        tok = ids_ref[base + t]
        return pltpu.make_async_copy(
            w_hbm.at[pl.ds(tok, 1), :],
            out_ref.at[pl.ds(t, 1), :],
            sem.at[slot],
        )

    # Prime the pipeline: start the first min(_POOL, tile_n) row gathers
    # (static, tiny unroll — one DMA per semaphore slot).
    n_prime = min(_POOL, tile_n)
    for t in range(n_prime):
        row_copy(t, t).start()

    # Steady state: wait row t (freeing its semaphore slot), then start row
    # t + _POOL on that same slot.  At most one live DMA per semaphore, up to
    # _POOL HBM row fetches in flight hiding gather latency.
    def body(t, carry):
        row_copy(t, t % _POOL).wait()
        if tile_n > _POOL:                        # static
            nxt = t + _POOL

            @pl.when(nxt < tile_n)
            def _():
                row_copy(nxt, nxt % _POOL).start()
        return carry

    lax.fori_loop(0, tile_n, body, 0, unroll=min(8, tile_n))


def word_embedding_forward(x, weight, *, tile_n=None):
    """nn.Embedding(padding_idx=0) lookup followed by Dropout(p=0) == identity.

    x      : (B, S) integer token ids
    weight : (ntoken, emb_dim) embedding table (row 0 is the zeroed padding row)
    Returns (B, S, emb_dim) in weight.dtype.
    """
    B, S = x.shape
    ntoken, emb_dim = weight.shape
    n = B * S
    row_bytes = emb_dim * jnp.dtype(weight.dtype).itemsize

    # Pick tile_n: big enough to amortize per-step overhead and DMA latency,
    # small enough that the double-buffered output tile fits VMEM on every
    # generation (v7x has only 64 MiB) and that the grid keeps >=2 steps
    # (v7x megacore = 2 TensorCores sharing the parallel grid axis).
    if tile_n is None:
        tile_n = _TARGET_TILE_BYTES // row_bytes
    tile_n = min(tile_n, max(_MAX_TILE_BYTES // row_bytes, 8))
    tile_n = min(tile_n, max(pl.cdiv(n, 2), 8))
    tile_n = max((tile_n // 8) * 8, 8)            # sublane-aligned block rows

    n_pad = pl.cdiv(n, tile_n) * tile_n

    # Flatten, clamp ids into range (an OOB id would otherwise be an OOB HBM
    # DMA), pad with id 0 (the zeroed padding row) up to a tile multiple.
    ids = jnp.clip(x.reshape(-1).astype(jnp.int32), 0, ntoken - 1)
    if n_pad != n:
        ids = jnp.concatenate([ids, jnp.zeros((n_pad - n,), jnp.int32)])

    # Scalar-prefetched ids live in SMEM (1D pads to next_pow2(4*len) bytes);
    # chunk very long sequences so the id table never blows the SMEM budget.
    chunk = max((_MAX_IDS_PER_CALL // tile_n) * tile_n, tile_n)

    vmem_limit = min(64 * 1024 * 1024,
                     max(32 * 1024 * 1024, 4 * tile_n * row_bytes))

    call = functools.partial(
        pl.pallas_call,
        _gather_kernel,
        compiler_params=pltpu.CompilerParams(
            dimension_semantics=("parallel",),
            vmem_limit_bytes=vmem_limit),
    )

    outs = []
    for start in range(0, n_pad, chunk):
        ids_c = ids[start:start + chunk]
        nc = ids_c.shape[0]                       # always a multiple of tile_n
        out_c = call(
            out_shape=jax.ShapeDtypeStruct((nc, emb_dim), weight.dtype),
            grid_spec=pltpu.PrefetchScalarGridSpec(
                num_scalar_prefetch=1,            # ids -> SMEM
                grid=(nc // tile_n,),
                in_specs=[pl.BlockSpec(memory_space=pl.ANY)],   # table stays in HBM
                out_specs=pl.BlockSpec((tile_n, emb_dim),
                                       lambda i, ids_ref: (i, 0)),
                scratch_shapes=[pltpu.SemaphoreType.DMA((_POOL,))],
            ),
        )(ids_c, weight)
        outs.append(out_c)

    out = outs[0] if len(outs) == 1 else jnp.concatenate(outs, axis=0)
    if n_pad != n:
        out = out[:n]
    return out.reshape(B, S, emb_dim)


if __name__ == "__main__":
    # Small, deterministic setup (lane-dense emb_dim; f32 table to match the
    # PyTorch defaults — a bf16 table would halve HBM gather traffic).
    ntoken, emb_dim = 256, 128
    B, S = 2, 8

    key = jax.random.PRNGKey(0)
    k_w, k_x = jax.random.split(key)

    # nn.Embedding default init: N(0, 1); padding_idx=0 row zeroed.
    weight = jax.random.normal(k_w, (ntoken, emb_dim), dtype=jnp.float32)
    weight = weight.at[0].set(0.0)

    # Token ids in [0, ntoken); include a padding (id 0) token.
    x = jax.random.randint(k_x, (B, S), 0, ntoken, dtype=jnp.int32)
    x = x.at[0, 0].set(0)

    out = jax.block_until_ready(word_embedding_forward(x, weight))

    # Correctness check against plain-JAX reference gather.
    ref = weight[x]
    assert out.shape == (B, S, emb_dim)
    assert jnp.array_equal(out, ref), "mismatch vs reference gather"
    assert jnp.all(out[0, 0] == 0.0), "padding_idx row must be zero"

    print("KERNEL_OK")
</pallas_src>

<mosaic_0001>
module attributes {stable_mosaic.version = 11 : i64} {
  func.func @_gather_kernel(%arg0: i32, %arg1: memref<16xi32, #tpu.memory_space<smem>>, %arg2: memref<256x128xf32, #tpu.memory_space<any>>, %arg3: memref<8x128xf32, #tpu.memory_space<vmem>>, %arg4: memref<16x!tpu.dma_semaphore, #tpu.memory_space<semaphore_mem>>) attributes {dimension_semantics = [#tpu.dimension_semantics<parallel>], iteration_bounds = array<i64: 2>, scalar_prefetch = 1 : i64, scratch_operands = 1 : i64, tpu.core_type = #tpu.core_type<tc>, window_params = [{}, {transform_indices = @transform_1, window_bounds = array<i64: 8, 128>}]} {
    %c8_i32 = arith.constant 8 : i32
    %0 = arith.muli %arg0, %c8_i32 : i32
    %c0_i32 = arith.constant 0 : i32
    %1 = arith.addi %0, %c0_i32 : i32
    %2 = arith.index_cast %1 : i32 to index
    %3 = memref.load %arg1[%2] : memref<16xi32, #tpu.memory_space<smem>>
    %c0_i32_0 = arith.constant 0 : i32
    %c0_i32_1 = arith.constant 0 : i32
    %4 = tpu.memref_slice %arg2[%3, %c0_i32_1] : memref<256x128xf32, #tpu.memory_space<any>> -> memref<1x128xf32, #tpu.memory_space<any>>
    %c0_i32_2 = arith.constant 0 : i32
    %c0_i32_3 = arith.constant 0 : i32
    %5 = tpu.memref_slice %arg3[%c0_i32_2, %c0_i32_3] : memref<8x128xf32, #tpu.memory_space<vmem>> -> memref<1x128xf32, #tpu.memory_space<vmem>>
    %6 = tpu.memref_slice %arg4[%c0_i32_0] : memref<16x!tpu.dma_semaphore, #tpu.memory_space<semaphore_mem>> -> memref<1x!tpu.dma_semaphore, #tpu.memory_space<semaphore_mem>>
    %7 = tpu.memref_squeeze %6 : memref<1x!tpu.dma_semaphore, #tpu.memory_space<semaphore_mem>> -> memref<!tpu.dma_semaphore, #tpu.memory_space<semaphore_mem>>
    tpu.enqueue_dma source(%4 : memref<1x128xf32, #tpu.memory_space<any>>) target(%5 : memref<1x128xf32, #tpu.memory_space<vmem>>) target_semaphore(%7 : memref<!tpu.dma_semaphore, #tpu.memory_space<semaphore_mem>>)
    %c1_i32 = arith.constant 1 : i32
    %8 = arith.addi %0, %c1_i32 : i32
    %9 = arith.index_cast %8 : i32 to index
    %10 = memref.load %arg1[%9] : memref<16xi32, #tpu.memory_space<smem>>
    %c1_i32_4 = arith.constant 1 : i32
    %c0_i32_5 = arith.constant 0 : i32
    %11 = tpu.memref_slice %arg2[%10, %c0_i32_5] : memref<256x128xf32, #tpu.memory_space<any>> -> memref<1x128xf32, #tpu.memory_space<any>>
    %c1_i32_6 = arith.constant 1 : i32
    %c0_i32_7 = arith.constant 0 : i32
    %12 = tpu.memref_slice %arg3[%c1_i32_6, %c0_i32_7] : memref<8x128xf32, #tpu.memory_space<vmem>> -> memref<1x128xf32, #tpu.memory_space<vmem>>
    %13 = tpu.memref_slice %arg4[%c1_i32_4] : memref<16x!tpu.dma_semaphore, #tpu.memory_space<semaphore_mem>> -> memref<1x!tpu.dma_semaphore, #tpu.memory_space<semaphore_mem>>
    %14 = tpu.memref_squeeze %13 : memref<1x!tpu.dma_semaphore, #tpu.memory_space<semaphore_mem>> -> memref<!tpu.dma_semaphore, #tpu.memory_space<semaphore_mem>>
    tpu.enqueue_dma source(%11 : memref<1x128xf32, #tpu.memory_space<any>>) target(%12 : memref<1x128xf32, #tpu.memory_space<vmem>>) target_semaphore(%14 : memref<!tpu.dma_semaphore, #tpu.memory_space<semaphore_mem>>)
    %c2_i32 = arith.constant 2 : i32
    %15 = arith.addi %0, %c2_i32 : i32
    %16 = arith.index_cast %15 : i32 to index
    %17 = memref.load %arg1[%16] : memref<16xi32, #tpu.memory_space<smem>>
    %c2_i32_8 = arith.constant 2 : i32
    %c0_i32_9 = arith.constant 0 : i32
    %18 = tpu.memref_slice %arg2[%17, %c0_i32_9] : memref<256x128xf32, #tpu.memory_space<any>> -> memref<1x128xf32, #tpu.memory_space<any>>
    %c2_i32_10 = arith.constant 2 : i32
    %c0_i32_11 = arith.constant 0 : i32
    %19 = tpu.memref_slice %arg3[%c2_i32_10, %c0_i32_11] : memref<8x128xf32, #tpu.memory_space<vmem>> -> memref<1x128xf32, #tpu.memory_space<vmem>>
    %20 = tpu.memref_slice %arg4[%c2_i32_8] : memref<16x!tpu.dma_semaphore, #tpu.memory_space<semaphore_mem>> -> memref<1x!tpu.dma_semaphore, #tpu.memory_space<semaphore_mem>>
    %21 = tpu.memref_squeeze %20 : memref<1x!tpu.dma_semaphore, #tpu.memory_space<semaphore_mem>> -> memref<!tpu.dma_semaphore, #tpu.memory_space<semaphore_mem>>
    tpu.enqueue_dma source(%18 : memref<1x128xf32, #tpu.memory_space<any>>) target(%19 : memref<1x128xf32, #tpu.memory_space<vmem>>) target_semaphore(%21 : memref<!tpu.dma_semaphore, #tpu.memory_space<semaphore_mem>>)
    %c3_i32 = arith.constant 3 : i32
    %22 = arith.addi %0, %c3_i32 : i32
    %23 = arith.index_cast %22 : i32 to index
    %24 = memref.load %arg1[%23] : memref<16xi32, #tpu.memory_space<smem>>
    %c3_i32_12 = arith.constant 3 : i32
    %c0_i32_13 = arith.constant 0 : i32
    %25 = tpu.memref_slice %arg2[%24, %c0_i32_13] : memref<256x128xf32, #tpu.memory_space<any>> -> memref<1x128xf32, #tpu.memory_space<any>>
    %c3_i32_14 = arith.constant 3 : i32
    %c0_i32_15 = arith.constant 0 : i32
    %26 = tpu.memref_slice %arg3[%c3_i32_14, %c0_i32_15] : memref<8x128xf32, #tpu.memory_space<vmem>> -> memref<1x128xf32, #tpu.memory_space<vmem>>
    %27 = tpu.memref_slice %arg4[%c3_i32_12] : memref<16x!tpu.dma_semaphore, #tpu.memory_space<semaphore_mem>> -> memref<1x!tpu.dma_semaphore, #tpu.memory_space<semaphore_mem>>
    %28 = tpu.memref_squeeze %27 : memref<1x!tpu.dma_semaphore, #tpu.memory_space<semaphore_mem>> -> memref<!tpu.dma_semaphore, #tpu.memory_space<semaphore_mem>>
    tpu.enqueue_dma source(%25 : memref<1x128xf32, #tpu.memory_space<any>>) target(%26 : memref<1x128xf32, #tpu.memory_space<vmem>>) target_semaphore(%28 : memref<!tpu.dma_semaphore, #tpu.memory_space<semaphore_mem>>)
    %c4_i32 = arith.constant 4 : i32
    %29 = arith.addi %0, %c4_i32 : i32
    %30 = arith.index_cast %29 : i32 to index
    %31 = memref.load %arg1[%30] : memref<16xi32, #tpu.memory_space<smem>>
    %c4_i32_16 = arith.constant 4 : i32
    %c0_i32_17 = arith.constant 0 : i32
    %32 = tpu.memref_slice %arg2[%31, %c0_i32_17] : memref<256x128xf32, #tpu.memory_space<any>> -> memref<1x128xf32, #tpu.memory_space<any>>
    %c4_i32_18 = arith.constant 4 : i32
    %c0_i32_19 = arith.constant 0 : i32
    %33 = tpu.memref_slice %arg3[%c4_i32_18, %c0_i32_19] : memref<8x128xf32, #tpu.memory_space<vmem>> -> memref<1x128xf32, #tpu.memory_space<vmem>>
    %34 = tpu.memref_slice %arg4[%c4_i32_16] : memref<16x!tpu.dma_semaphore, #tpu.memory_space<semaphore_mem>> -> memref<1x!tpu.dma_semaphore, #tpu.memory_space<semaphore_mem>>
    %35 = tpu.memref_squeeze %34 : memref<1x!tpu.dma_semaphore, #tpu.memory_space<semaphore_mem>> -> memref<!tpu.dma_semaphore, #tpu.memory_space<semaphore_mem>>
    tpu.enqueue_dma source(%32 : memref<1x128xf32, #tpu.memory_space<any>>) target(%33 : memref<1x128xf32, #tpu.memory_space<vmem>>) target_semaphore(%35 : memref<!tpu.dma_semaphore, #tpu.memory_space<semaphore_mem>>)
    %c5_i32 = arith.constant 5 : i32
    %36 = arith.addi %0, %c5_i32 : i32
    %37 = arith.index_cast %36 : i32 to index
    %38 = memref.load %arg1[%37] : memref<16xi32, #tpu.memory_space<smem>>
    %c5_i32_20 = arith.constant 5 : i32
    %c0_i32_21 = arith.constant 0 : i32
    %39 = tpu.memref_slice %arg2[%38, %c0_i32_21] : memref<256x128xf32, #tpu.memory_space<any>> -> memref<1x128xf32, #tpu.memory_space<any>>
    %c5_i32_22 = arith.constant 5 : i32
    %c0_i32_23 = arith.constant 0 : i32
    %40 = tpu.memref_slice %arg3[%c5_i32_22, %c0_i32_23] : memref<8x128xf32, #tpu.memory_space<vmem>> -> memref<1x128xf32, #tpu.memory_space<vmem>>
    %41 = tpu.memref_slice %arg4[%c5_i32_20] : memref<16x!tpu.dma_semaphore, #tpu.memory_space<semaphore_mem>> -> memref<1x!tpu.dma_semaphore, #tpu.memory_space<semaphore_mem>>
    %42 = tpu.memref_squeeze %41 : memref<1x!tpu.dma_semaphore, #tpu.memory_space<semaphore_mem>> -> memref<!tpu.dma_semaphore, #tpu.memory_space<semaphore_mem>>
    tpu.enqueue_dma source(%39 : memref<1x128xf32, #tpu.memory_space<any>>) target(%40 : memref<1x128xf32, #tpu.memory_space<vmem>>) target_semaphore(%42 : memref<!tpu.dma_semaphore, #tpu.memory_space<semaphore_mem>>)
    %c6_i32 = arith.constant 6 : i32
    %43 = arith.addi %0, %c6_i32 : i32
    %44 = arith.index_cast %43 : i32 to index
    %45 = memref.load %arg1[%44] : memref<16xi32, #tpu.memory_space<smem>>
    %c6_i32_24 = arith.constant 6 : i32
    %c0_i32_25 = arith.constant 0 : i32
    %46 = tpu.memref_slice %arg2[%45, %c0_i32_25] : memref<256x128xf32, #tpu.memory_space<any>> -> memref<1x128xf32, #tpu.memory_space<any>>
    %c6_i32_26 = arith.constant 6 : i32
    %c0_i32_27 = arith.constant 0 : i32
    %47 = tpu.memref_slice %arg3[%c6_i32_26, %c0_i32_27] : memref<8x128xf32, #tpu.memory_space<vmem>> -> memref<1x128xf32, #tpu.memory_space<vmem>>
    %48 = tpu.memref_slice %arg4[%c6_i32_24] : memref<16x!tpu.dma_semaphore, #tpu.memory_space<semaphore_mem>> -> memref<1x!tpu.dma_semaphore, #tpu.memory_space<semaphore_mem>>
    %49 = tpu.memref_squeeze %48 : memref<1x!tpu.dma_semaphore, #tpu.memory_space<semaphore_mem>> -> memref<!tpu.dma_semaphore, #tpu.memory_space<semaphore_mem>>
    tpu.enqueue_dma source(%46 : memref<1x128xf32, #tpu.memory_space<any>>) target(%47 : memref<1x128xf32, #tpu.memory_space<vmem>>) target_semaphore(%49 : memref<!tpu.dma_semaphore, #tpu.memory_space<semaphore_mem>>)
    %c7_i32 = arith.constant 7 : i32
    %50 = arith.addi %0, %c7_i32 : i32
    %51 = arith.index_cast %50 : i32 to index
    %52 = memref.load %arg1[%51] : memref<16xi32, #tpu.memory_space<smem>>
    %c7_i32_28 = arith.constant 7 : i32
    %c0_i32_29 = arith.constant 0 : i32
    %53 = tpu.memref_slice %arg2[%52, %c0_i32_29] : memref<256x128xf32, #tpu.memory_space<any>> -> memref<1x128xf32, #tpu.memory_space<any>>
    %c7_i32_30 = arith.constant 7 : i32
    %c0_i32_31 = arith.constant 0 : i32
    %54 = tpu.memref_slice %arg3[%c7_i32_30, %c0_i32_31] : memref<8x128xf32, #tpu.memory_space<vmem>> -> memref<1x128xf32, #tpu.memory_space<vmem>>
    %55 = tpu.memref_slice %arg4[%c7_i32_28] : memref<16x!tpu.dma_semaphore, #tpu.memory_space<semaphore_mem>> -> memref<1x!tpu.dma_semaphore, #tpu.memory_space<semaphore_mem>>
    %56 = tpu.memref_squeeze %55 : memref<1x!tpu.dma_semaphore, #tpu.memory_space<semaphore_mem>> -> memref<!tpu.dma_semaphore, #tpu.memory_space<semaphore_mem>>
    tpu.enqueue_dma source(%53 : memref<1x128xf32, #tpu.memory_space<any>>) target(%54 : memref<1x128xf32, #tpu.memory_space<vmem>>) target_semaphore(%56 : memref<!tpu.dma_semaphore, #tpu.memory_space<semaphore_mem>>)
    %c0_i32_32 = arith.constant 0 : i32
    %c16_i32 = arith.constant 16 : i32
    %c0_i32_33 = arith.constant 0 : i32
    %57 = arith.cmpi eq, %c16_i32, %c0_i32_33 : i32
    %c1_i32_34 = arith.constant 1 : i32
    %58 = arith.select %57, %c1_i32_34, %c16_i32 : i32
    %59 = arith.remsi %c0_i32_32, %58 : i32
    %c0_i32_35 = arith.constant 0 : i32
    %60 = arith.cmpi ne, %59, %c0_i32_35 : i32
    %c0_i32_36 = arith.constant 0 : i32
    %61 = arith.cmpi slt, %59, %c0_i32_36 : i32
    %c0_i32_37 = arith.constant 0 : i32
    %62 = arith.cmpi slt, %58, %c0_i32_37 : i32
    %63 = arith.xori %61, %62 : i1
    %64 = arith.andi %63, %60 : i1
    %65 = arith.addi %59, %58 : i32
    %66 = arith.select %64, %65, %59 : i32
    %67 = arith.addi %0, %c0_i32_32 : i32
    %68 = arith.index_cast %67 : i32 to index
    %69 = memref.load %arg1[%68] : memref<16xi32, #tpu.memory_space<smem>>
    %c0_i32_38 = arith.constant 0 : i32
    %70 = tpu.memref_slice %arg2[%69, %c0_i32_38] : memref<256x128xf32, #tpu.memory_space<any>> -> memref<1x128xf32, #tpu.memory_space<any>>
    %c0_i32_39 = arith.constant 0 : i32
    %71 = tpu.memref_slice %arg3[%c0_i32_32, %c0_i32_39] : memref<8x128xf32, #tpu.memory_space<vmem>> -> memref<1x128xf32, #tpu.memory_space<vmem>>
    %72 = tpu.memref_slice %arg4[%66] : memref<16x!tpu.dma_semaphore, #tpu.memory_space<semaphore_mem>> -> memref<1x!tpu.dma_semaphore, #tpu.memory_space<semaphore_mem>>
    %73 = tpu.memref_squeeze %72 : memref<1x!tpu.dma_semaphore, #tpu.memory_space<semaphore_mem>> -> memref<!tpu.dma_semaphore, #tpu.memory_space<semaphore_mem>>
    tpu.wait_dma2 semaphore(%73 : memref<!tpu.dma_semaphore, #tpu.memory_space<semaphore_mem>>) src(%70 : memref<1x128xf32, #tpu.memory_space<any>>) dst(%71 : memref<1x128xf32, #tpu.memory_space<vmem>>)
    %c1_i32_40 = arith.constant 1 : i32
    %c16_i32_41 = arith.constant 16 : i32
    %c0_i32_42 = arith.constant 0 : i32
    %74 = arith.cmpi eq, %c16_i32_41, %c0_i32_42 : i32
    %c1_i32_43 = arith.constant 1 : i32
    %75 = arith.select %74, %c1_i32_43, %c16_i32_41 : i32
    %76 = arith.remsi %c1_i32_40, %75 : i32
    %c0_i32_44 = arith.constant 0 : i32
    %77 = arith.cmpi ne, %76, %c0_i32_44 : i32
    %c0_i32_45 = arith.constant 0 : i32
    %78 = arith.cmpi slt, %76, %c0_i32_45 : i32
    %c0_i32_46 = arith.constant 0 : i32
    %79 = arith.cmpi slt, %75, %c0_i32_46 : i32
    %80 = arith.xori %78, %79 : i1
    %81 = arith.andi %80, %77 : i1
    %82 = arith.addi %76, %75 : i32
    %83 = arith.select %81, %82, %76 : i32
    %84 = arith.addi %0, %c1_i32_40 : i32
    %85 = arith.index_cast %84 : i32 to index
    %86 = memref.load %arg1[%85] : memref<16xi32, #tpu.memory_space<smem>>
    %c0_i32_47 = arith.constant 0 : i32
    %87 = tpu.memref_slice %arg2[%86, %c0_i32_47] : memref<256x128xf32, #tpu.memory_space<any>> -> memref<1x128xf32, #tpu.memory_space<any>>
    %c0_i32_48 = arith.constant 0 : i32
    %88 = tpu.memref_slice %arg3[%c1_i32_40, %c0_i32_48] : memref<8x128xf32, #tpu.memory_space<vmem>> -> memref<1x128xf32, #tpu.memory_space<vmem>>
    %89 = tpu.memref_slice %arg4[%83] : memref<16x!tpu.dma_semaphore, #tpu.memory_space<semaphore_mem>> -> memref<1x!tpu.dma_semaphore, #tpu.memory_space<semaphore_mem>>
    %90 = tpu.memref_squeeze %89 : memref<1x!tpu.dma_semaphore, #tpu.memory_space<semaphore_mem>> -> memref<!tpu.dma_semaphore, #tpu.memory_space<semaphore_mem>>
    tpu.wait_dma2 semaphore(%90 : memref<!tpu.dma_semaphore, #tpu.memory_space<semaphore_mem>>) src(%87 : memref<1x128xf32, #tpu.memory_space<any>>) dst(%88 : memref<1x128xf32, #tpu.memory_space<vmem>>)
    %c2_i32_49 = arith.constant 2 : i32
    %c16_i32_50 = arith.constant 16 : i32
    %c0_i32_51 = arith.constant 0 : i32
    %91 = arith.cmpi eq, %c16_i32_50, %c0_i32_51 : i32
    %c1_i32_52 = arith.constant 1 : i32
    %92 = arith.select %91, %c1_i32_52, %c16_i32_50 : i32
    %93 = arith.remsi %c2_i32_49, %92 : i32
    %c0_i32_53 = arith.constant 0 : i32
    %94 = arith.cmpi ne, %93, %c0_i32_53 : i32
    %c0_i32_54 = arith.constant 0 : i32
    %95 = arith.cmpi slt, %93, %c0_i32_54 : i32
    %c0_i32_55 = arith.constant 0 : i32
    %96 = arith.cmpi slt, %92, %c0_i32_55 : i32
    %97 = arith.xori %95, %96 : i1
    %98 = arith.andi %97, %94 : i1
    %99 = arith.addi %93, %92 : i32
    %100 = arith.select %98, %99, %93 : i32
    %101 = arith.addi %0, %c2_i32_49 : i32
    %102 = arith.index_cast %101 : i32 to index
    %103 = memref.load %arg1[%102] : memref<16xi32, #tpu.memory_space<smem>>
    %c0_i32_56 = arith.constant 0 : i32
    %104 = tpu.memref_slice %arg2[%103, %c0_i32_56] : memref<256x128xf32, #tpu.memory_space<any>> -> memref<1x128xf32, #tpu.memory_space<any>>
    %c0_i32_57 = arith.constant 0 : i32
    %105 = tpu.memref_slice %arg3[%c2_i32_49, %c0_i32_57] : memref<8x128xf32, #tpu.memory_space<vmem>> -> memref<1x128xf32, #tpu.memory_space<vmem>>
    %106 = tpu.memref_slice %arg4[%100] : memref<16x!tpu.dma_semaphore, #tpu.memory_space<semaphore_mem>> -> memref<1x!tpu.dma_semaphore, #tpu.memory_space<semaphore_mem>>
    %107 = tpu.memref_squeeze %106 : memref<1x!tpu.dma_semaphore, #tpu.memory_space<semaphore_mem>> -> memref<!tpu.dma_semaphore, #tpu.memory_space<semaphore_mem>>
    tpu.wait_dma2 semaphore(%107 : memref<!tpu.dma_semaphore, #tpu.memory_space<semaphore_mem>>) src(%104 : memref<1x128xf32, #tpu.memory_space<any>>) dst(%105 : memref<1x128xf32, #tpu.memory_space<vmem>>)
    %c3_i32_58 = arith.constant 3 : i32
    %c16_i32_59 = arith.constant 16 : i32
    %c0_i32_60 = arith.constant 0 : i32
    %108 = arith.cmpi eq, %c16_i32_59, %c0_i32_60 : i32
    %c1_i32_61 = arith.constant 1 : i32
    %109 = arith.select %108, %c1_i32_61, %c16_i32_59 : i32
    %110 = arith.remsi %c3_i32_58, %109 : i32
    %c0_i32_62 = arith.constant 0 : i32
    %111 = arith.cmpi ne, %110, %c0_i32_62 : i32
    %c0_i32_63 = arith.constant 0 : i32
    %112 = arith.cmpi slt, %110, %c0_i32_63 : i32
    %c0_i32_64 = arith.constant 0 : i32
    %113 = arith.cmpi slt, %109, %c0_i32_64 : i32
    %114 = arith.xori %112, %113 : i1
    %115 = arith.andi %114, %111 : i1
    %116 = arith.addi %110, %109 : i32
    %117 = arith.select %115, %116, %110 : i32
    %118 = arith.addi %0, %c3_i32_58 : i32
    %119 = arith.index_cast %118 : i32 to index
    %120 = memref.load %arg1[%119] : memref<16xi32, #tpu.memory_space<smem>>
    %c0_i32_65 = arith.constant 0 : i32
    %121 = tpu.memref_slice %arg2[%120, %c0_i32_65] : memref<256x128xf32, #tpu.memory_space<any>> -> memref<1x128xf32, #tpu.memory_space<any>>
    %c0_i32_66 = arith.constant 0 : i32
    %122 = tpu.memref_slice %arg3[%c3_i32_58, %c0_i32_66] : memref<8x128xf32, #tpu.memory_space<vmem>> -> memref<1x128xf32, #tpu.memory_space<vmem>>
    %123 = tpu.memref_slice %arg4[%117] : memref<16x!tpu.dma_semaphore, #tpu.memory_space<semaphore_mem>> -> memref<1x!tpu.dma_semaphore, #tpu.memory_space<semaphore_mem>>
    %124 = tpu.memref_squeeze %123 : memref<1x!tpu.dma_semaphore, #tpu.memory_space<semaphore_mem>> -> memref<!tpu.dma_semaphore, #tpu.memory_space<semaphore_mem>>
    tpu.wait_dma2 semaphore(%124 : memref<!tpu.dma_semaphore, #tpu.memory_space<semaphore_mem>>) src(%121 : memref<1x128xf32, #tpu.memory_space<any>>) dst(%122 : memref<1x128xf32, #tpu.memory_space<vmem>>)
    %c4_i32_67 = arith.constant 4 : i32
    %c16_i32_68 = arith.constant 16 : i32
    %c0_i32_69 = arith.constant 0 : i32
    %125 = arith.cmpi eq, %c16_i32_68, %c0_i32_69 : i32
    %c1_i32_70 = arith.constant 1 : i32
    %126 = arith.select %125, %c1_i32_70, %c16_i32_68 : i32
    %127 = arith.remsi %c4_i32_67, %126 : i32
    %c0_i32_71 = arith.constant 0 : i32
    %128 = arith.cmpi ne, %127, %c0_i32_71 : i32
    %c0_i32_72 = arith.constant 0 : i32
    %129 = arith.cmpi slt, %127, %c0_i32_72 : i32
    %c0_i32_73 = arith.constant 0 : i32
    %130 = arith.cmpi slt, %126, %c0_i32_73 : i32
    %131 = arith.xori %129, %130 : i1
    %132 = arith.andi %131, %128 : i1
    %133 = arith.addi %127, %126 : i32
    %134 = arith.select %132, %133, %127 : i32
    %135 = arith.addi %0, %c4_i32_67 : i32
    %136 = arith.index_cast %135 : i32 to index
    %137 = memref.load %arg1[%136] : memref<16xi32, #tpu.memory_space<smem>>
    %c0_i32_74 = arith.constant 0 : i32
    %138 = tpu.memref_slice %arg2[%137, %c0_i32_74] : memref<256x128xf32, #tpu.memory_space<any>> -> memref<1x128xf32, #tpu.memory_space<any>>
    %c0_i32_75 = arith.constant 0 : i32
    %139 = tpu.memref_slice %arg3[%c4_i32_67, %c0_i32_75] : memref<8x128xf32, #tpu.memory_space<vmem>> -> memref<1x128xf32, #tpu.memory_space<vmem>>
    %140 = tpu.memref_slice %arg4[%134] : memref<16x!tpu.dma_semaphore, #tpu.memory_space<semaphore_mem>> -> memref<1x!tpu.dma_semaphore, #tpu.memory_space<semaphore_mem>>
    %141 = tpu.memref_squeeze %140 : memref<1x!tpu.dma_semaphore, #tpu.memory_space<semaphore_mem>> -> memref<!tpu.dma_semaphore, #tpu.memory_space<semaphore_mem>>
    tpu.wait_dma2 semaphore(%141 : memref<!tpu.dma_semaphore, #tpu.memory_space<semaphore_mem>>) src(%138 : memref<1x128xf32, #tpu.memory_space<any>>) dst(%139 : memref<1x128xf32, #tpu.memory_space<vmem>>)
    %c5_i32_76 = arith.constant 5 : i32
    %c16_i32_77 = arith.constant 16 : i32
    %c0_i32_78 = arith.constant 0 : i32
    %142 = arith.cmpi eq, %c16_i32_77, %c0_i32_78 : i32
    %c1_i32_79 = arith.constant 1 : i32
    %143 = arith.select %142, %c1_i32_79, %c16_i32_77 : i32
    %144 = arith.remsi %c5_i32_76, %143 : i32
    %c0_i32_80 = arith.constant 0 : i32
    %145 = arith.cmpi ne, %144, %c0_i32_80 : i32
    %c0_i32_81 = arith.constant 0 : i32
    %146 = arith.cmpi slt, %144, %c0_i32_81 : i32
    %c0_i32_82 = arith.constant 0 : i32
    %147 = arith.cmpi slt, %143, %c0_i32_82 : i32
    %148 = arith.xori %146, %147 : i1
    %149 = arith.andi %148, %145 : i1
    %150 = arith.addi %144, %143 : i32
    %151 = arith.select %149, %150, %144 : i32
    %152 = arith.addi %0, %c5_i32_76 : i32
    %153 = arith.index_cast %152 : i32 to index
    %154 = memref.load %arg1[%153] : memref<16xi32, #tpu.memory_space<smem>>
    %c0_i32_83 = arith.constant 0 : i32
    %155 = tpu.memref_slice %arg2[%154, %c0_i32_83] : memref<256x128xf32, #tpu.memory_space<any>> -> memref<1x128xf32, #tpu.memory_space<any>>
    %c0_i32_84 = arith.constant 0 : i32
    %156 = tpu.memref_slice %arg3[%c5_i32_76, %c0_i32_84] : memref<8x128xf32, #tpu.memory_space<vmem>> -> memref<1x128xf32, #tpu.memory_space<vmem>>
    %157 = tpu.memref_slice %arg4[%151] : memref<16x!tpu.dma_semaphore, #tpu.memory_space<semaphore_mem>> -> memref<1x!tpu.dma_semaphore, #tpu.memory_space<semaphore_mem>>
    %158 = tpu.memref_squeeze %157 : memref<1x!tpu.dma_semaphore, #tpu.memory_space<semaphore_mem>> -> memref<!tpu.dma_semaphore, #tpu.memory_space<semaphore_mem>>
    tpu.wait_dma2 semaphore(%158 : memref<!tpu.dma_semaphore, #tpu.memory_space<semaphore_mem>>) src(%155 : memref<1x128xf32, #tpu.memory_space<any>>) dst(%156 : memref<1x128xf32, #tpu.memory_space<vmem>>)
    %c6_i32_85 = arith.constant 6 : i32
    %c16_i32_86 = arith.constant 16 : i32
    %c0_i32_87 = arith.constant 0 : i32
    %159 = arith.cmpi eq, %c16_i32_86, %c0_i32_87 : i32
    %c1_i32_88 = arith.constant 1 : i32
    %160 = arith.select %159, %c1_i32_88, %c16_i32_86 : i32
    %161 = arith.remsi %c6_i32_85, %160 : i32
    %c0_i32_89 = arith.constant 0 : i32
    %162 = arith.cmpi ne, %161, %c0_i32_89 : i32
    %c0_i32_90 = arith.constant 0 : i32
    %163 = arith.cmpi slt, %161, %c0_i32_90 : i32
    %c0_i32_91 = arith.constant 0 : i32
    %164 = arith.cmpi slt, %160, %c0_i32_91 : i32
    %165 = arith.xori %163, %164 : i1
    %166 = arith.andi %165, %162 : i1
    %167 = arith.addi %161, %160 : i32
    %168 = arith.select %166, %167, %161 : i32
    %169 = arith.addi %0, %c6_i32_85 : i32
    %170 = arith.index_cast %169 : i32 to index
    %171 = memref.load %arg1[%170] : memref<16xi32, #tpu.memory_space<smem>>
    %c0_i32_92 = arith.constant 0 : i32
    %172 = tpu.memref_slice %arg2[%171, %c0_i32_92] : memref<256x128xf32, #tpu.memory_space<any>> -> memref<1x128xf32, #tpu.memory_space<any>>
    %c0_i32_93 = arith.constant 0 : i32
    %173 = tpu.memref_slice %arg3[%c6_i32_85, %c0_i32_93] : memref<8x128xf32, #tpu.memory_space<vmem>> -> memref<1x128xf32, #tpu.memory_space<vmem>>
    %174 = tpu.memref_slice %arg4[%168] : memref<16x!tpu.dma_semaphore, #tpu.memory_space<semaphore_mem>> -> memref<1x!tpu.dma_semaphore, #tpu.memory_space<semaphore_mem>>
    %175 = tpu.memref_squeeze %174 : memref<1x!tpu.dma_semaphore, #tpu.memory_space<semaphore_mem>> -> memref<!tpu.dma_semaphore, #tpu.memory_space<semaphore_mem>>
    tpu.wait_dma2 semaphore(%175 : memref<!tpu.dma_semaphore, #tpu.memory_space<semaphore_mem>>) src(%172 : memref<1x128xf32, #tpu.memory_space<any>>) dst(%173 : memref<1x128xf32, #tpu.memory_space<vmem>>)
    %c7_i32_94 = arith.constant 7 : i32
    %c16_i32_95 = arith.constant 16 : i32
    %c0_i32_96 = arith.constant 0 : i32
    %176 = arith.cmpi eq, %c16_i32_95, %c0_i32_96 : i32
    %c1_i32_97 = arith.constant 1 : i32
    %177 = arith.select %176, %c1_i32_97, %c16_i32_95 : i32
    %178 = arith.remsi %c7_i32_94, %177 : i32
    %c0_i32_98 = arith.constant 0 : i32
    %179 = arith.cmpi ne, %178, %c0_i32_98 : i32
    %c0_i32_99 = arith.constant 0 : i32
    %180 = arith.cmpi slt, %178, %c0_i32_99 : i32
    %c0_i32_100 = arith.constant 0 : i32
    %181 = arith.cmpi slt, %177, %c0_i32_100 : i32
    %182 = arith.xori %180, %181 : i1
    %183 = arith.andi %182, %179 : i1
    %184 = arith.addi %178, %177 : i32
    %185 = arith.select %183, %184, %178 : i32
    %186 = arith.addi %0, %c7_i32_94 : i32
    %187 = arith.index_cast %186 : i32 to index
    %188 = memref.load %arg1[%187] : memref<16xi32, #tpu.memory_space<smem>>
    %c0_i32_101 = arith.constant 0 : i32
    %189 = tpu.memref_slice %arg2[%188, %c0_i32_101] : memref<256x128xf32, #tpu.memory_space<any>> -> memref<1x128xf32, #tpu.memory_space<any>>
    %c0_i32_102 = arith.constant 0 : i32
    %190 = tpu.memref_slice %arg3[%c7_i32_94, %c0_i32_102] : memref<8x128xf32, #tpu.memory_space<vmem>> -> memref<1x128xf32, #tpu.memory_space<vmem>>
    %191 = tpu.memref_slice %arg4[%185] : memref<16x!tpu.dma_semaphore, #tpu.memory_space<semaphore_mem>> -> memref<1x!tpu.dma_semaphore, #tpu.memory_space<semaphore_mem>>
    %192 = tpu.memref_squeeze %191 : memref<1x!tpu.dma_semaphore, #tpu.memory_space<semaphore_mem>> -> memref<!tpu.dma_semaphore, #tpu.memory_space<semaphore_mem>>
    tpu.wait_dma2 semaphore(%192 : memref<!tpu.dma_semaphore, #tpu.memory_space<semaphore_mem>>) src(%189 : memref<1x128xf32, #tpu.memory_space<any>>) dst(%190 : memref<1x128xf32, #tpu.memory_space<vmem>>)
    %c8_i32_103 = arith.constant 8 : i32
    return
  }
  func.func @transform_1(%arg0: i32, %arg1: memref<16xi32, #tpu.memory_space<smem>>) -> (i32, i32) {
    %c0_i32 = arith.constant 0 : i32
    %c0_i32_0 = arith.constant 0 : i32
    return %arg0, %c0_i32 : i32, i32
  }
}

</mosaic_0001>

<bundles_post_ra>
// kernel: tpu_custom_call.1
= control target key start
LH: loop header
LB: loop body
LE: loop exit
PB: predicated region body
PF: predicated region fallthrough
CT: control target
= control target key end

     0   :  { %s1210_s0 = inlined_call_operand.hbm [shape: s32[16], index: 0, kind: input, shape index: {}]   ;;  %s1211_s1 = inlined_call_operand.hbm [shape: f32[256,128], index: 1, kind: input, shape index: {}]   ;;  %s1212_s2 = inlined_call_operand.hbm [shape: f32[16,128], index: 2, kind: output, shape index: {}]  }
   0x1   :  { %s497_s11 = scalar_lea.hbm %s1210_s0, 16 }
   0x2   :  { %p498_p0 = scmp.ne.s32.totalorder %s1210_s0, %s497_s11  ;;  %p501_p1 = scmp.lt.u32.totalorder %s497_s11, %s1210_s0 }
   0x4   :  { %p503_p2 = pnand %p501_p1, %p498_p0 }
   0x6   :  { %506 = shalt.err (!%p503_p2)  }
   0x7   :  { %s823_s16 = smov [#allocation4]  }
   0x8   :  { %8 = dma.hbm_to_smem %s1210_s0, 16, %s823_s16, [#allocation3] }
   0x9   :  { %773 = dma.done.wait [#allocation3], 16 }
   0xa   :  { %774 = vsyncadd [#allocation3], 4294967280 }
   0xb   :  { %10 = sfence }
   0xc   :  { %11 = vsyncpa [#allocation6], 0 }
   0xd   :  { %13 = vsyncpa [#allocation6 + $0x1], 0  ;;  %s852_s19 = smov 0   ;;  %s854_s20 = smov 0  }
   0xe   :  { %s856_s21 = smov 0  }
   0xf LB: > { %s395_s0 = sadd.s32 4294967295, %s821_s21   ;;  %s869_s22 = sadd.s32 1, %s821_s21   ;;  %s821_s21 = sphi %s856_s21, %s1225_s21   ;;  %s817_s20 = sphi %s854_s20, %s1224_s20   ;;  %s813_s19 = sphi %s852_s19, %s1223_s19  }
  0x10   : > { %s22_s23 = ssub.s32 %s821_s21, %s869_s22  ;;  %s25_s24 = sadd.s32 1, %s817_s20 }
  0x11   : > { %p23_p3 = scmp.eq.s32.totalorder %s22_s23, 0  ;;  %p396_p4 = scmp.ne.s32.totalorder %s22_s23, 0 }
  0x12   : > { %p29_p5 = scmp.eq.s32.totalorder %s821_s21, 1  ;;  %p34_p6 = scmp.ne.s32.totalorder %s817_s20, %s813_s19 }
  0x13   : > { %s878_s25 = scalar_select %p23_p3, %s817_s20, %s25_s24  }
  0x14   : > { %p880_p7 = por %p396_p4, %p29_p5  ;;  %p35_p8 = scmp.eq.s32.totalorder %s395_s0, 1 }
  0x15   : > { %p470_p9 = scmp.lt.s32.totalorder %s821_s21, 2  ;;  %s49_s28 = sand.u32 1, %s817_s20  }
  0x16   : > { %s1215_s26 = scalar_select %p880_p7, 1, 0 }
  0x17   : > { %p885_p10 = por %p35_p8, %p34_p6  ;;  %s398_s29 = sshll.u32 %s49_s28, 3 }
  0x18   : > { %s893_s30 = sshll.u32 %s821_s21, 3  ;;  %s901_s6 = scalar_lea.vmem [#allocation5], %s398_s29 }
  0x19   : > { %s1216_s27 = scalar_select %p885_p10, 1, 0 }
  0x1a   : > { %s67_s3 = sadd.s32 1, %s893_s30  ;;  %s63_s7 = sshll.u32 %s901_s6, 4  ;;  %s905_s7 = int_to_ptr.vmem [resolvable:$true] %s63_s7 }
  0x1b   : > { %s431_s4 = scalar_select %p470_p9, [#allocation4], [#allocation25] }
  0x1c   : > { %s432_s5 = scalar_select %p470_p9, %s893_s30, 0 }
  0x1d   : > { %s71_s8 = scalar_lea.vmem %s901_s6, 1 [#allocation5]  ;;  %s1227_s3 = smov (!%p470_p9, %s67_s3), 0 }
  0x1e   : > { %s53_s9 = sld [smem:[%s431_s4 + %s432_s5]]  ;;  %s80_s11 = sshll.u32 %s71_s8, 4  ;;  %s914_s11 = int_to_ptr.vmem [resolvable:$true] %s80_s11 }
  0x1f   : > { %s434_s10 = scalar_select %p470_p9, [#allocation4], [#allocation26] }
  0x20   : > { %s84_s12 = sadd.s32 2, %s893_s30  ;;  %s88_s16 = scalar_lea.vmem %s901_s6, 2 [#allocation5] }
  0x21   : > { %s912_s13 = sld [smem:[%s434_s10 + %s1227_s3]]  ;;  %s97_s23 = sshll.u32 %s88_s16, 4  ;;  %s958_s23 = int_to_ptr.vmem [resolvable:$true] %s97_s23 }
  0x22   : > { %s918_s14 = scalar_select %p470_p9, [#allocation4], [#allocation27] }
  0x23   : > { %s929_s4 = scalar_lea.hbm %s1211_s1, 4096 }
  0x24   : > { %s400_s15 = sshll.u32 %s53_s9, 4 }
  0x25   : > { %s55_s0 = scalar_lea.hbm %s1211_s1, %s400_s15 }
  0x26   : > { %s507_s24 = scalar_lea.hbm %s55_s0, 16  ;;  %p512_p0 = scmp.lt.u32.totalorder %s55_s0, %s1211_s1 }
  0x27   : > { %p508_p11 = scmp.ne.s32.totalorder %s55_s0, %s507_s24  ;;  %p513_p1 = scmp.lt.u32.totalorder %s929_s4, %s507_s24 }
  0x28   : > { %p515_p3 = scmp.lt.u32.totalorder %s507_s24, %s55_s0 }
  0x29   : > { %p509_p12 = pnand %p508_p11, %p470_p9  ;;  %p514_p2 = por %p513_p1, %p512_p0 }
  0x2b   : > { %p510_p13 = pneg %p509_p12  ;;  %p516_p4 = por %p515_p3, %p514_p2 }
  0x2d   : > { %p517_p5 = pnand %p516_p4, %p510_p13 }
  0x2f   : > { %520 = shalt.err (!%p517_p5)  }
  0x30   : > { %s521_s9 = scalar_lea.vmem %s905_s7, 16  ;;  %s824_s10 = smov [#allocation5]  }
  0x31   : > { %p522_p6 = scmp.ne.s32.totalorder %s905_s7, %s521_s9  ;;  %s525_s15 = sshll.u32 %s824_s10, 4  ;;  %s939_s15 = int_to_ptr.vmem [resolvable:$false] %s525_s15 }
  0x32   : > { %s942_s16 = scalar_lea.vmem %s939_s15, 256  ;;  %p1213_p12 = scmp.lt.s32.totalorder %s905_s7, %s939_s15 }
  0x33   : > { %p523_p8 = pnand %p522_p6, %p470_p9  ;;  %p529_p13 = scmp.lt.s32.totalorder %s942_s16, %s521_s9 }
  0x35   : > { %p524_p11 = pneg %p523_p8  ;;  %p530_p0 = por %p529_p13, %p1213_p12 }
  0x37   : > { %p531_p1 = pnand %p530_p0, %p524_p11 }
  0x39   : > { %534 = shalt.err (!%p531_p1)  }
  0x3a   : > { %433 = dma.hbm_to_vmem [thread:$0]  (%p470_p9), %s55_s0, 16, %s905_s7, [#allocation2] }
  0x3b   : > { %s1229_s12 = smov (!%p470_p9, %s84_s12), 0  ;;  %s401_s17 = sshll.u32 %s912_s13, 4 }
  0x3c   : > { %s70_s29 = scalar_lea.hbm %s1211_s1, %s401_s17  ;;  %s964_s3 = sld [smem:[%s918_s14 + %s1229_s12]] }
  0x3d   : > { %s535_s5 = scalar_lea.hbm %s70_s29, 16  ;;  %p540_p5 = scmp.lt.u32.totalorder %s70_s29, %s1211_s1 }
  0x3e   : > { %p536_p2 = scmp.ne.s32.totalorder %s70_s29, %s535_s5  ;;  %p541_p6 = scmp.lt.u32.totalorder %s929_s4, %s535_s5 }
  0x3f   : > { %p543_p11 = scmp.lt.u32.totalorder %s535_s5, %s70_s29 }
  0x40   : > { %p537_p3 = pnand %p536_p2, %p470_p9  ;;  %p542_p8 = por %p541_p6, %p540_p5 }
  0x42   : > { %p538_p4 = pneg %p537_p3  ;;  %p544_p13 = por %p543_p11, %p542_p8 }
  0x44   : > { %p545_p0 = pnand %p544_p13, %p538_p4 }
  0x46   : > { %548 = shalt.err (!%p545_p0)  }
  0x47   : > { %s549_s12 = scalar_lea.vmem %s914_s11, 16  ;;  %p556_p12 = scmp.lt.s32.totalorder %s914_s11, %s939_s15 }
  0x48   : > { %p550_p1 = scmp.ne.s32.totalorder %s914_s11, %s549_s12  ;;  %p557_p10 = scmp.lt.s32.totalorder %s942_s16, %s549_s12 }
  0x4a   : > { %p551_p2 = pnand %p550_p1, %p470_p9  ;;  %p558_p7 = por %p557_p10, %p556_p12 }
  0x4c   : > { %p552_p3 = pneg %p551_p2 }
  0x4e   : > { %p559_p5 = pnand %p558_p7, %p552_p3 }
  0x50   : > { %562 = shalt.err (!%p559_p5)  }
  0x51   : > { %436 = dma.hbm_to_vmem [thread:$0]  (%p470_p9), %s70_s29, 16, %s914_s11, [#allocation2 + $0x1] }
  0x52   : > { %s101_s13 = sadd.s32 3, %s893_s30  ;;  %s105_s14 = scalar_lea.vmem %s901_s6, 3 [#allocation5] }
  0x53   : > { %s440_s0 = scalar_select %p470_p9, [#allocation4], [#allocation28] }
  0x54   : > { %s1231_s13 = smov (!%p470_p9, %s101_s13), 0  ;;  %s114_s10 = sshll.u32 %s105_s14, 4  ;;  %s995_s10 = int_to_ptr.vmem [resolvable:$true] %s114_s10 }
  0x55   : > { %s118_s17 = sadd.s32 4, %s893_s30  ;;  %s402_s18 = sshll.u32 %s964_s3, 4 }
  0x56   : > { %s990_s24 = sld [smem:[%s440_s0 + %s1231_s13]]  ;;  %s87_s9 = scalar_lea.hbm %s1211_s1, %s402_s18 }
  0x57   : > { %s563_s12 = scalar_lea.hbm %s87_s9, 16  ;;  %p568_p4 = scmp.lt.u32.totalorder %s87_s9, %s1211_s1 }
  0x58   : > { %p564_p7 = scmp.ne.s32.totalorder %s87_s9, %s563_s12  ;;  %p569_p6 = scmp.lt.u32.totalorder %s929_s4, %s563_s12 }
  0x59   : > { %p571_p11 = scmp.lt.u32.totalorder %s563_s12, %s87_s9 }
  0x5a   : > { %p565_p10 = pnand %p564_p7, %p470_p9  ;;  %p570_p8 = por %p569_p6, %p568_p4 }
  0x5c   : > { %p566_p12 = pneg %p565_p10  ;;  %p572_p13 = por %p571_p11, %p570_p8 }
  0x5e   : > { %p573_p0 = pnand %p572_p13, %p566_p12 }
  0x60   : > { %576 = shalt.err (!%p573_p0)  }
  0x61   : > { %s577_s3 = scalar_lea.vmem %s958_s23, 16  ;;  %p584_p5 = scmp.lt.s32.totalorder %s958_s23, %s939_s15 }
  0x62   : > { %p578_p1 = scmp.ne.s32.totalorder %s958_s23, %s577_s3  ;;  %p585_p7 = scmp.lt.s32.totalorder %s942_s16, %s577_s3 }
  0x64   : > { %p579_p2 = pnand %p578_p1, %p470_p9  ;;  %p586_p10 = por %p585_p7, %p584_p5 }
  0x66   : > { %p580_p3 = pneg %p579_p2 }
  0x68   : > { %p587_p4 = pnand %p586_p10, %p580_p3 }
  0x6a   : > { %590 = shalt.err (!%p587_p4)  }
  0x6b   : > { %439 = dma.hbm_to_vmem [thread:$0]  (%p470_p9), %s87_s9, 16, %s958_s23, [#allocation2 + $0x2] }
  0x6c   : > { %s443_s13 = scalar_select %p470_p9, [#allocation4], [#allocation29] }
  0x6d   : > { %s1233_s17 = smov (!%p470_p9, %s118_s17), 0  ;;  %s122_s14 = scalar_lea.vmem %s901_s6, 4 [#allocation5] }
  0x6e   : > { %s135_s0 = sadd.s32 5, %s893_s30  ;;  %s403_s18 = sshll.u32 %s990_s24, 4 }
  0x6f   : > { %s1020_s5 = sld [smem:[%s443_s13 + %s1233_s17]]  ;;  %s104_s11 = scalar_lea.hbm %s1211_s1, %s403_s18 }
  0x70   : > { %s131_s29 = sshll.u32 %s122_s14, 4  ;;  %s591_s3 = scalar_lea.hbm %s104_s11, 16  ;;  %s132_s29 = int_to_ptr.vmem [resolvable:$true] %s131_s29 }
  0x71   : > { %p592_p12 = scmp.ne.s32.totalorder %s104_s11, %s591_s3  ;;  %p596_p11 = scmp.lt.u32.totalorder %s104_s11, %s1211_s1 }
  0x72   : > { %p597_p13 = scmp.lt.u32.totalorder %s929_s4, %s591_s3  ;;  %p599_p1 = scmp.lt.u32.totalorder %s591_s3, %s104_s11 }
  0x73   : > { %p593_p6 = pnand %p592_p12, %p470_p9 }
  0x74   : > { %p598_p0 = por %p597_p13, %p596_p11 }
  0x75   : > { %p594_p8 = pneg %p593_p6 }
  0x76   : > { %p600_p2 = por %p599_p1, %p598_p0 }
  0x78   : > { %p601_p3 = pnand %p600_p2, %p594_p8 }
  0x7a   : > { %604 = shalt.err (!%p601_p3)  }
  0x7b   : > { %s605_s17 = scalar_lea.vmem %s995_s10, 16  ;;  %p612_p4 = scmp.lt.s32.totalorder %s995_s10, %s939_s15 }
  0x7c   : > { %p606_p5 = scmp.ne.s32.totalorder %s995_s10, %s605_s17  ;;  %p613_p12 = scmp.lt.s32.totalorder %s942_s16, %s605_s17 }
  0x7e   : > { %p607_p7 = pnand %p606_p5, %p470_p9  ;;  %p614_p6 = por %p613_p12, %p612_p4 }
  0x80   : > { %p608_p10 = pneg %p607_p7 }
  0x82   : > { %p615_p11 = pnand %p614_p6, %p608_p10 }
  0x84   : > { %618 = shalt.err (!%p615_p11)  }
  0x85   : > { %442 = dma.hbm_to_vmem [thread:$0]  (%p470_p9), %s104_s11, 16, %s995_s10, [#allocation2 + $0x3] }
  0x86   : > { %s139_s24 = scalar_lea.vmem %s901_s6, 5 [#allocation5]  ;;  %s1235_s0 = smov (!%p470_p9, %s135_s0), 0 }
  0x87   : > { %s446_s13 = scalar_select %p470_p9, [#allocation4], [#allocation30] }
  0x88   : > { %s404_s14 = sshll.u32 %s1020_s5, 4  ;;  %s148_s18 = sshll.u32 %s139_s24, 4  ;;  %s1064_s18 = int_to_ptr.vmem [resolvable:$true] %s148_s18 }
  0x89   : > { %s121_s3 = scalar_lea.hbm %s1211_s1, %s404_s14  ;;  %s1050_s23 = sld [smem:[%s446_s13 + %s1235_s0]] }
  0x8a   : > { %s619_s9 = scalar_lea.hbm %s121_s3, 16  ;;  %p624_p1 = scmp.lt.u32.totalorder %s121_s3, %s1211_s1 }
  0x8b   : > { %p620_p8 = scmp.ne.s32.totalorder %s121_s3, %s619_s9  ;;  %p625_p2 = scmp.lt.u32.totalorder %s929_s4, %s619_s9 }
  0x8c   : > { %p627_p5 = scmp.lt.u32.totalorder %s619_s9, %s121_s3 }
  0x8d   : > { %p621_p13 = pnand %p620_p8, %p470_p9  ;;  %p626_p3 = por %p625_p2, %p624_p1 }
  0x8f   : > { %p622_p0 = pneg %p621_p13  ;;  %p628_p7 = por %p627_p5, %p626_p3 }
  0x91   : > { %p629_p10 = pnand %p628_p7, %p622_p0 }
  0x93   : > { %632 = shalt.err (!%p629_p10)  }
  0x94   : > { %s633_s5 = scalar_lea.vmem %s132_s29, 16  ;;  %p640_p11 = scmp.lt.s32.totalorder %s132_s29, %s939_s15 }
  0x95   : > { %p634_p4 = scmp.ne.s32.totalorder %s132_s29, %s633_s5  ;;  %p641_p8 = scmp.lt.s32.totalorder %s942_s16, %s633_s5 }
  0x97   : > { %p635_p12 = pnand %p634_p4, %p470_p9  ;;  %p642_p13 = por %p641_p8, %p640_p11 }
  0x99   : > { %p636_p6 = pneg %p635_p12 }
  0x9b   : > { %p643_p1 = pnand %p642_p13, %p636_p6 }
  0x9d   : > { %646 = shalt.err (!%p643_p1)  }
  0x9e   : > { %445 = dma.hbm_to_vmem [thread:$0]  (%p470_p9), %s121_s3, 16, %s132_s29, [#allocation2 + $0x4] }
  0x9f   : > { %s152_s0 = sadd.s32 6, %s893_s30  ;;  %s156_s24 = scalar_lea.vmem %s901_s6, 6 [#allocation5] }
  0xa0   : > { %s449_s17 = scalar_select %p470_p9, [#allocation4], [#allocation31] }
  0xa1   : > { %s1237_s0 = smov (!%p470_p9, %s152_s0), 0  ;;  %s169_s13 = sadd.s32 7, %s893_s30 }
  0xa2   : > { %s405_s14 = sshll.u32 %s1050_s23, 4  ;;  %s1074_s8 = sld [smem:[%s449_s17 + %s1237_s0]] }
  0xa3   : > { %s138_s10 = scalar_lea.hbm %s1211_s1, %s405_s14  ;;  %s165_s11 = sshll.u32 %s156_s24, 4  ;;  %s166_s11 = int_to_ptr.vmem [resolvable:$true] %s165_s11 }
  0xa4   : > { %s647_s5 = scalar_lea.hbm %s138_s10, 16  ;;  %p652_p5 = scmp.lt.u32.totalorder %s138_s10, %s1211_s1 }
  0xa5   : > { %p648_p0 = scmp.ne.s32.totalorder %s138_s10, %s647_s5  ;;  %p653_p7 = scmp.lt.u32.totalorder %s929_s4, %s647_s5 }
  0xa6   : > { %p655_p4 = scmp.lt.u32.totalorder %s647_s5, %s138_s10 }
  0xa7   : > { %p649_p2 = pnand %p648_p0, %p470_p9  ;;  %p654_p10 = por %p653_p7, %p652_p5 }
  0xa9   : > { %p650_p3 = pneg %p649_p2  ;;  %p656_p12 = por %p655_p4, %p654_p10 }
  0xab   : > { %p657_p6 = pnand %p656_p12, %p650_p3 }
  0xad   : > { %660 = shalt.err (!%p657_p6)  }
  0xae   : > { %s661_s30 = scalar_lea.vmem %s1064_s18, 16  ;;  %p668_p1 = scmp.lt.s32.totalorder %s1064_s18, %s939_s15 }
  0xaf   : > { %p662_p11 = scmp.ne.s32.totalorder %s1064_s18, %s661_s30  ;;  %p669_p0 = scmp.lt.s32.totalorder %s942_s16, %s661_s30 }
  0xb1   : > { %p663_p8 = pnand %p662_p11, %p470_p9  ;;  %p670_p2 = por %p669_p0, %p668_p1 }
  0xb3   : > { %p664_p13 = pneg %p663_p8 }
  0xb5   : > { %p671_p5 = pnand %p670_p2, %p664_p13 }
  0xb7   : > { %674 = shalt.err (!%p671_p5)  }
  0xb8   : > { %448 = dma.hbm_to_vmem [thread:$0]  (%p470_p9), %s138_s10, 16, %s1064_s18, [#allocation2 + $0x5] }
  0xb9   : > { %s452_s23 = scalar_select %p470_p9, [#allocation4], [#allocation32] }
  0xba   : > { %s1239_s13 = smov (!%p470_p9, %s169_s13), 0  ;;  %s406_s0 = sshll.u32 %s1074_s8, 4 }
  0xbb   : > { %s173_s17 = scalar_lea.vmem %s901_s6, 7 [#allocation5]  ;;  %s155_s12 = scalar_lea.hbm %s1211_s1, %s406_s0 }
  0xbc   : > { %s170_s9 = sld [smem:[%s452_s23 + %s1239_s13]]  ;;  %s675_s5 = scalar_lea.hbm %s155_s12, 16 }
  0xbd   : > { %p676_p3 = scmp.ne.s32.totalorder %s155_s12, %s675_s5  ;;  %p680_p4 = scmp.lt.u32.totalorder %s155_s12, %s1211_s1 }
  0xbe   : > { %p681_p12 = scmp.lt.u32.totalorder %s929_s4, %s675_s5  ;;  %p683_p11 = scmp.lt.u32.totalorder %s675_s5, %s155_s12 }
  0xbf   : > { %p677_p7 = pnand %p676_p3, %p470_p9 }
  0xc0   : > { %p682_p6 = por %p681_p12, %p680_p4 }
  0xc1   : > { %p678_p10 = pneg %p677_p7 }
  0xc2   : > { %p684_p8 = por %p683_p11, %p682_p6 }
  0xc4   : > { %p685_p13 = pnand %p684_p8, %p678_p10 }
  0xc6   : > { %688 = shalt.err (!%p685_p13)  }
  0xc7   : > { %s689_s6 = scalar_lea.vmem %s166_s11, 16  ;;  %p696_p5 = scmp.lt.s32.totalorder %s166_s11, %s939_s15 }
  0xc8   : > { %p690_p1 = scmp.ne.s32.totalorder %s166_s11, %s689_s6  ;;  %p697_p3 = scmp.lt.s32.totalorder %s942_s16, %s689_s6 }
  0xca   : > { %p691_p0 = pnand %p690_p1, %p470_p9  ;;  %p698_p7 = por %p697_p3, %p696_p5 }
  0xcc   : > { %p692_p2 = pneg %p691_p0 }
  0xce   : > { %p699_p4 = pnand %p698_p7, %p692_p2 }
  0xd0   : > { %702 = shalt.err (!%p699_p4)  }
  0xd1   : > { %451 = dma.hbm_to_vmem [thread:$0]  (%p470_p9), %s155_s12, 16, %s166_s11, [#allocation2 + $0x6] }
  0xd2   : > { %s182_s18 = sshll.u32 %s173_s17, 4  ;;  %s407_s13 = sshll.u32 %s170_s9, 4  ;;  %s183_s18 = int_to_ptr.vmem [resolvable:$true] %s182_s18 }
  0xd3   : > { %s172_s30 = scalar_lea.hbm %s1211_s1, %s407_s13 }
  0xd4   : > { %s703_s23 = scalar_lea.hbm %s172_s30, 16  ;;  %p708_p11 = scmp.lt.u32.totalorder %s172_s30, %s1211_s1 }
  0xd5   : > { %p704_p10 = scmp.ne.s32.totalorder %s172_s30, %s703_s23  ;;  %p709_p8 = scmp.lt.u32.totalorder %s929_s4, %s703_s23 }
  0xd6   : > { %p711_p1 = scmp.lt.u32.totalorder %s703_s23, %s172_s30 }
  0xd7   : > { %p705_p12 = pnand %p704_p10, %p470_p9  ;;  %p710_p13 = por %p709_p8, %p708_p11 }
  0xd9   : > { %p706_p6 = pneg %p705_p12  ;;  %p712_p0 = por %p711_p1, %p710_p13 }
  0xdb   : > { %p713_p2 = pnand %p712_p0, %p706_p6 }
  0xdd   : > { %716 = shalt.err (!%p713_p2)  }
  0xde   : > { %s717_s11 = scalar_lea.vmem %s183_s18, 16  ;;  %p724_p4 = scmp.lt.s32.totalorder %s183_s18, %s939_s15 }
  0xdf   : > { %p718_p5 = scmp.ne.s32.totalorder %s183_s18, %s717_s11  ;;  %p725_p10 = scmp.lt.s32.totalorder %s942_s16, %s717_s11 }
  0xe1   : > { %p719_p3 = pnand %p718_p5, %p470_p9  ;;  %p726_p12 = por %p725_p10, %p724_p4 }
  0xe3   : > { %p720_p7 = pneg %p719_p3 }
  0xe5   : > { %p727_p8 = pnand %p726_p12, %p720_p7 }
  0xe7   : > { %730 = shalt.err (!%p727_p8)  }
  0xe8   : > { %454 = dma.hbm_to_vmem [thread:$0]  (%p470_p9), %s172_s30, 16, %s183_s18, [#allocation2 + $0x7] }
  0xe9   : > { %776 = dma.done.wait (%p470_p9), [#allocation2], 16 }
  0xea   : > { %778 = vsyncadd (%p470_p9), [#allocation2], 4294967280 }
  0xeb   : > { %780 = dma.done.wait (%p470_p9), [#allocation2 + $0x1], 16 }
  0xec   : > { %782 = vsyncadd (%p470_p9), [#allocation2 + $0x1], 4294967280 }
  0xed   : > { %784 = dma.done.wait (%p470_p9), [#allocation2 + $0x2], 16 }
  0xee   : > { %786 = vsyncadd (%p470_p9), [#allocation2 + $0x2], 4294967280 }
  0xef   : > { %788 = dma.done.wait (%p470_p9), [#allocation2 + $0x3], 16 }
  0xf0   : > { %790 = vsyncadd (%p470_p9), [#allocation2 + $0x3], 4294967280 }
  0xf1   : > { %792 = dma.done.wait (%p470_p9), [#allocation2 + $0x4], 16 }
  0xf2   : > { %794 = vsyncadd (%p470_p9), [#allocation2 + $0x4], 4294967280 }
  0xf3   : > { %796 = dma.done.wait (%p470_p9), [#allocation2 + $0x5], 16 }
  0xf4   : > { %798 = vsyncadd (%p470_p9), [#allocation2 + $0x5], 4294967280 }
  0xf5   : > { %800 = dma.done.wait (%p470_p9), [#allocation2 + $0x6], 16 }
  0xf6   : > { %802 = vsyncadd (%p470_p9), [#allocation2 + $0x6], 4294967280 }
  0xf7   : > { %804 = dma.done.wait (%p470_p9), [#allocation2 + $0x7], 16 }
  0xf8   : > { %806 = vsyncadd (%p470_p9), [#allocation2 + $0x7], 4294967280  ;;  %s409_s4 = sshll.u32 %s821_s21, 7  ;;  %p1217_p6 = scmp.ne.s32.totalorder %s1215_s26, 0 }
  0xf9   : > { %s223_s12 = scalar_lea.hbm %s1212_s2, %s409_s4  ;;  %s237_s5 = sand.u32 1, %s813_s19  }
  0xfa   : > { %p1171_p11 = pnand %p470_p9, %p1217_p6  ;;  %s212_s29 = scalar_lea.sflag [#allocation6], %s49_s28 }
  0xfb   : > { %s731_s3 = scalar_lea.vmem %s905_s7, 128  ;;  %p1219_p7 = scmp.lt.s32.totalorder %s905_s7, %s939_s15 }
  0xfc   : > { %s1218_s9 = scalar_select %p1171_p11, 1, 0 }
  0xfd   : > { %p732_p1 = scmp.ne.s32.totalorder %s905_s7, %s731_s3  ;;  %p733_p0 = pneg %p1171_p11 }
  0xfe   : > { %p740_p3 = scmp.lt.s32.totalorder %s942_s16, %s731_s3 }
  0xff   : > { %p734_p2 = pnand %p733_p0, %p732_p1 }
 0x100   : > { %p741_p4 = por %p740_p3, %p1219_p7 }
 0x101   : > { %p735_p5 = pneg %p734_p2 }
 0x103   : > { %p742_p10 = pnand %p741_p4, %p735_p5 }
 0x105   : > { %745 = shalt.err (!%p742_p10)
}
 0x106   : > { %s746_s26 = scalar_lea.hbm %s223_s12, 128  ;;  %s751_s19 = scalar_lea.hbm %s1212_s2, 256 }
 0x107   : > { %p747_p9 = scmp.ne.s32.totalorder %s223_s12, %s746_s26  ;;  %p752_p6 = scmp.lt.u32.totalorder %s223_s12, %s1212_s2 }
 0x108   : > { %p753_p13 = scmp.lt.u32.totalorder %s751_s19, %s746_s26  ;;  %p755_p2 = scmp.lt.u32.totalorder %s746_s26, %s223_s12 }
 0x109   : > { %p749_p12 = pnand %p747_p9, %p733_p0 }
 0x10a   : > { %p754_p1 = por %p753_p13, %p752_p6 }
 0x10b   : > { %p750_p8 = pneg %p749_p12 }
 0x10c   : > { %p756_p11 = por %p755_p2, %p754_p1 }
 0x10e   : > { %p757_p3 = pnand %p756_p11, %p750_p8 }
 0x110   : > { %760 = shalt.err (!%p757_p3)
}
 0x111   : > { %p1220_p5 = scmp.ne.s32.totalorder %s1218_s9, 0  ;;  %p1221_p0 = scmp.ne.s32.totalorder %s1216_s27, 0 }
 0x112   : > { %p1222_p7 = scmp.ge.s32.totalorder %s821_s21, 1  ;;  %s238_s15 = scalar_lea.sflag [#allocation6], %s237_s5 }
 0x113   : > { %465 = dma.vmem_to_hbm [thread:$0]  (!%p1220_p5), %s905_s7, 128, %s223_s12, %s212_s29  }
 0x114   : > { %p467_p4 = pnand %p1222_p7, %p1221_p0 }
 0x116   : > { %808 = dma.done.wait (!%p467_p4), %s238_s15, 128  }
 0x117   : > { %810 = vsyncadd (!%p467_p4), %s238_s15, 4294967168  ;;  %p16_p13 = scmp.ge.s32.totalorder %s869_s22, 3   ;;  %s1223_s19 = smov %s817_s20 }
 0x118   : > { %s1224_s20 = smov %s878_s25  ;;  %s1225_s21 = smov %s869_s22 }
 0x119   :  { %18 = sbr.rel (!%p16_p13) target bundleno = 15 (0xf), region = 113 }
 0x120   :  { %243 = vsyncpa [#allocation6], 1 }
 0x121   :  { %245 = vsyncpa [#allocation6 + $0x1], 1 }
 0x122   :  { %246 = vsyncmov [#allocation2] }
 0x125   :  { %s247_s21 = vpop.sfrf %246 }
 0x126   :  { %p412_p11 = scmp.ne.s32.totalorder %s247_s21, 0 }
 0x128   :  { %251 = shalt.err (%p412_p11)  }
 0x129   :  { %253 = vsyncmov [#allocation2 + $0x1] }
 0x12c   :  { %s254_s27 = vpop.sfrf %253 }
 0x12d   :  { %p413_p10 = scmp.ne.s32.totalorder %s254_s27, 0 }
 0x12f   :  { %258 = shalt.err (%p413_p10)  }
 0x130   :  { %260 = vsyncmov [#allocation2 + $0x2] }
 0x133   :  { %s261_s7 = vpop.sfrf %260 }
 0x134   :  { %p414_p9 = scmp.ne.s32.totalorder %s261_s7, 0 }
 0x136   :  { %265 = shalt.err (%p414_p9)  }
 0x137   :  { %267 = vsyncmov [#allocation2 + $0x3] }
 0x13a   :  { %s268_s16 = vpop.sfrf %267 }
 0x13b   :  { %p415_p12 = scmp.ne.s32.totalorder %s268_s16, 0 }
 0x13d   :  { %272 = shalt.err (%p415_p12)  }
 0x13e   :  { %274 = vsyncmov [#allocation2 + $0x4] }
 0x141   :  { %s275_s22 = vpop.sfrf %274 }
 0x142   :  { %p416_p8 = scmp.ne.s32.totalorder %s275_s22, 0 }
 0x144   :  { %279 = shalt.err (%p416_p8)  }
 0x145   :  { %281 = vsyncmov [#allocation2 + $0x5] }
 0x148   :  { %s282_s1 = vpop.sfrf %281 }
 0x149   :  { %p417_p6 = scmp.ne.s32.totalorder %s282_s1, 0 }
 0x14b   :  { %286 = shalt.err (%p417_p6)  }
 0x14c   :  { %288 = vsyncmov [#allocation2 + $0x6] }
 0x14f   :  { %s289_s2 = vpop.sfrf %288 }
 0x150   :  { %p418_p1 = scmp.ne.s32.totalorder %s289_s2, 0 }
 0x152   :  { %293 = shalt.err (%p418_p1)  }
 0x153   :  { %295 = vsyncmov [#allocation2 + $0x7] }
 0x156   :  { %s296_s20 = vpop.sfrf %295 }
 0x157   :  { %p419_p2 = scmp.ne.s32.totalorder %s296_s20, 0 }
 0x159   :  { %300 = shalt.err (%p419_p2)  }
 0x15a   :  { %302 = vsyncmov [#allocation2 + $0x8] }
 0x15d   :  { %s303_s25 = vpop.sfrf %302 }
 0x15e   :  { %p420_p3 = scmp.ne.s32.totalorder %s303_s25, 0 }
 0x160   :  { %307 = shalt.err (%p420_p3)  }
 0x161   :  { %309 = vsyncmov [#allocation2 + $0x9] }
 0x164   :  { %s310_s8 = vpop.sfrf %309 }
 0x165   :  { %p421_p5 = scmp.ne.s32.totalorder %s310_s8, 0 }
 0x167   :  { %314 = shalt.err (%p421_p5)  }
 0x168   :  { %316 = vsyncmov [#allocation2 + $0xa] }
 0x16b   :  { %s317_s10 = vpop.sfrf %316 }
 0x16c   :  { %p422_p0 = scmp.ne.s32.totalorder %s317_s10, 0 }
 0x16e   :  { %321 = shalt.err (%p422_p0)  }
 0x16f   :  { %323 = vsyncmov [#allocation2 + $0xb] }
 0x172   :  { %s324_s30 = vpop.sfrf %323 }
 0x173   :  { %p423_p7 = scmp.ne.s32.totalorder %s324_s30, 0 }
 0x175   :  { %328 = shalt.err (%p423_p7)  }
 0x176   :  { %330 = vsyncmov [#allocation2 + $0xc] }
 0x179   :  { %s331_s23 = vpop.sfrf %330 }
 0x17a   :  { %p424_p4 = scmp.ne.s32.totalorder %s331_s23, 0 }
 0x17c   :  { %335 = shalt.err (%p424_p4)  }
 0x17d   :  { %337 = vsyncmov [#allocation2 + $0xd] }
 0x180   :  { %s338_s0 = vpop.sfrf %337 }
 0x181   :  { %p425_p13 = scmp.ne.s32.totalorder %s338_s0, 0 }
 0x183   :  { %342 = shalt.err (%p425_p13)  }
 0x184   :  { %344 = vsyncmov [#allocation2 + $0xe] }
 0x187   :  { %s345_s24 = vpop.sfrf %344 }
 0x188   :  { %p426_p11 = scmp.ne.s32.totalorder %s345_s24, 0 }
 0x18a   :  { %349 = shalt.err (%p426_p11)  }
 0x18b   :  { %351 = vsyncmov [#allocation2 + $0xf] }
 0x18e   :  { %s352_s11 = vpop.sfrf %351 }
 0x18f   :  { %p427_p10 = scmp.ne.s32.totalorder %s352_s11, 0 }
 0x191   :  { %356 = shalt.err (%p427_p10)  }

</bundles_post_ra>
